<compile_context>
chip_gen: v7x
topology: tpu7x:2x2x1
jax: 0.10.0
libtpu: 0.0.40
codegen_flags: <defaults>
</compile_context>

<pallas_src>
import jax
import jax.numpy as jnp
from jax.experimental import pallas as pl
from jax.experimental.pallas import tpu as pltpu


def _round_up(x, m):
    return ((x + m - 1) // m) * m


def _patch_embed_kernel(p_ref, w_ref, pos_ref, o_ref):
    # p_ref:   (1, TM, Kp) bf16 patch rows (row 0 of the first tile is the
    #                       all-zero "cls" row)
    # w_ref:   (Kp, Ep)    bf16 flattened conv weight
    # pos_ref: (TM, Ep)    f32  positional rows with cls token / conv bias folded in
    # o_ref:   (1, TM, Ep) output tile, dense lane/sublane-aligned store
    acc = jnp.dot(p_ref[0], w_ref[...], preferred_element_type=jnp.float32)
    o_ref[0] = (acc + pos_ref[...]).astype(o_ref.dtype)


def patch_embedding(x, conv_w, conv_b, cls_token, pos_emb, patch_size,
                    out_dtype=None):
    """x: (B, C, H, W) NCHW. conv_w: (E, C, P, P). conv_b: (E,).
    cls_token: (1, 1, E). pos_emb: (N+1, E). Returns (B, N+1, E)."""
    B, C, H, W = x.shape
    P = patch_size
    E = conv_w.shape[0]
    Hp, Wp = H // P, W // P
    N = Hp * Wp
    K = C * P * P
    rows = N + 1                       # cls + patch rows
    if not jnp.issubdtype(x.dtype, jnp.floating):
        raise TypeError("patch_embedding expects a floating-point input")
    out_dtype = x.dtype if out_dtype is None else jnp.dtype(out_dtype)
    out_bytes = jnp.dtype(out_dtype).itemsize

    # ---- padded / tiled sizes: (8,128)-aligned lanes, MXU-dense contraction --
    Kp = _round_up(K, 128)
    Ep = _round_up(E, 128)

    def tile_vmem_bytes(tm):
        # double-buffered windows the Pallas pipeline holds resident
        return 2 * (tm * Kp * 2 + Kp * Ep * 2 + tm * Ep * 4 + tm * Ep * out_bytes)

    VMEM_BUDGET = 32 * 2**20           # conservative: leaves headroom on v7x (64 MiB/TC)
    if rows <= 1024 and tile_vmem_bytes(rows) <= VMEM_BUDGET:
        TM = rows                      # whole sequence per tile: no row padding,
                                       # no output slice, weight/pos DMA'd once
    else:
        cands = [tm for tm in range(64, 513, 8) if tile_vmem_bytes(tm) <= VMEM_BUDGET]
        if not cands:
            cands = [64]
        # mem-bound kernel: padded rows are real traffic -> minimise waste,
        # tie-break towards bigger tiles (fewer grid steps, better DMA).
        TM = min(cands, key=lambda tm: (_round_up(rows, tm) - rows, -tm))
    Rp = _round_up(rows, TM)
    n_m = Rp // TM

    # ---- glue: patchify (== Conv2d stride==kernel, NCHW), bf16 BEFORE pad ----
    patches = x.reshape(B, C, Hp, P, Wp, P).transpose(0, 2, 4, 1, 3, 5)
    patches = patches.reshape(B, N, K).astype(jnp.bfloat16)
    # leading zero row -> cls position; trailing zeros -> row-tile padding
    patches = jnp.pad(patches, ((0, 0), (1, Rp - rows), (0, Kp - K)))

    # ---- glue: parameter prep (tiny, one-shot) -------------------------------
    w_flat = conv_w.reshape(E, K).T                                   # (K, E)
    w_flat = jnp.pad(w_flat, ((0, Kp - K), (0, Ep - E))).astype(jnp.bfloat16)
    pos_f32 = pos_emb.astype(jnp.float32)                             # (rows, E)
    add_rows = jnp.concatenate(
        [cls_token.reshape(1, E).astype(jnp.float32) + pos_f32[0:1],  # cls + pos[0]
         pos_f32[1:] + conv_b.astype(jnp.float32)[None, :]],          # pos[1:] + bias
        axis=0)
    add_rows = jnp.pad(add_rows, ((0, Rp - rows), (0, Ep - E)))       # (Rp, Ep)

    # ---- scheduling hints (honest per-stream accounting) ---------------------
    flops = 2 * B * Rp * Kp * Ep
    bytes_accessed = (B * Rp * Kp * 2        # patch rows (bf16)
                      + Kp * Ep * 2          # weight, fetched once
                      + Rp * Ep * 4          # pos rows, fetched once per row tile
                      + B * Rp * Ep * out_bytes)
    vmem_limit = int(min(max(1.5 * tile_vmem_bytes(TM) + (1 << 20), 8 << 20),
                         48 << 20))

    out = pl.pallas_call(
        _patch_embed_kernel,
        out_shape=jax.ShapeDtypeStruct((B, Rp, Ep), out_dtype),
        grid_spec=pltpu.PrefetchScalarGridSpec(
            num_scalar_prefetch=0,
            # batch innermost: weight/pos block indices are constant across
            # consecutive steps, so their re-DMA is skipped.
            grid=(n_m, B),
            in_specs=[
                pl.BlockSpec((1, TM, Kp), lambda m, b: (b, m, 0)),
                pl.BlockSpec((Kp, Ep), lambda m, b: (0, 0)),
                pl.BlockSpec((TM, Ep), lambda m, b: (m, 0)),
            ],
            out_specs=pl.BlockSpec((1, TM, Ep), lambda m, b: (b, m, 0)),
        ),
        compiler_params=pltpu.CompilerParams(
            dimension_semantics=("parallel", "parallel"),
            vmem_limit_bytes=vmem_limit,
        ),
        cost_estimate=pl.CostEstimate(
            flops=flops, transcendentals=0, bytes_accessed=bytes_accessed),
    )(patches, w_flat, add_rows)

    # Only slice if padding was actually introduced (realistic ViT shapes:
    # E % 128 == 0 and TM == rows, so this is a no-op and no extra HBM pass).
    if Rp != rows or Ep != E:
        out = out[:, :rows, :E]
    return out


if __name__ == "__main__":
    # Small shapes consistent with the module.
    B, C, IMG, P, E = 2, 4, 16, 4, 32
    N = (IMG // P) ** 2  # 16 patches -> seq length 17

    key = jax.random.PRNGKey(0)
    k_x, k_w, k_b, k_cls, k_pos = jax.random.split(key, 5)

    x = jax.random.normal(k_x, (B, C, IMG, IMG), dtype=jnp.float32)
    conv_w = jax.random.normal(k_w, (E, C, P, P), dtype=jnp.float32) * 0.02
    conv_b = jax.random.normal(k_b, (E,), dtype=jnp.float32) * 0.02
    cls_token = jax.random.normal(k_cls, (1, 1, E), dtype=jnp.float32)
    pos_emb = jax.random.normal(k_pos, (N + 1, E), dtype=jnp.float32)

    fn = jax.jit(patch_embedding, static_argnums=5)
    out = fn(x, conv_w, conv_b, cls_token, pos_emb, P)
    out = jax.block_until_ready(out)

    # Reference check (plain JAX, same math; matmul inputs rounded to bf16 like
    # the kernel's MXU path, accumulation in f32).
    Hp = Wp = IMG // P
    patches_ref = (x.reshape(B, C, Hp, P, Wp, P)
                     .transpose(0, 2, 4, 1, 3, 5)
                     .reshape(B, N, C * P * P))
    p_bf = patches_ref.astype(jnp.bfloat16).astype(jnp.float32)
    w_bf = conv_w.reshape(E, -1).astype(jnp.bfloat16).astype(jnp.float32)
    ref_proj = jnp.einsum("bnk,ek->bne", p_bf, w_bf,
                          preferred_element_type=jnp.float32) + conv_b
    ref = jnp.concatenate(
        [jnp.broadcast_to(cls_token, (B, 1, E)), ref_proj], axis=1) + pos_emb

    assert out.shape == (B, N + 1, E)
    assert jnp.allclose(out, ref, atol=5e-3, rtol=5e-3)
    print("KERNEL_OK")
</pallas_src>

<mosaic_0001>
module attributes {stable_mosaic.version = 11 : i64} {
  func.func @_patch_embed_kernel(%arg0: i32, %arg1: i32, %arg2: memref<1x17x128xbf16, #tpu.memory_space<vmem>>, %arg3: memref<128x128xbf16, #tpu.memory_space<vmem>>, %arg4: memref<17x128xf32, #tpu.memory_space<vmem>>, %arg5: memref<1x17x128xf32, #tpu.memory_space<vmem>>) attributes {dimension_semantics = [#tpu.dimension_semantics<parallel>, #tpu.dimension_semantics<parallel>], iteration_bounds = array<i64: 1, 2>, scalar_prefetch = 0 : i64, scratch_operands = 0 : i64, tpu.core_type = #tpu.core_type<tc>, window_params = [{transform_indices = @transform_0, window_bounds = array<i64: 1, 17, 128>}, {pipeline_mode = #tpu.pipeline_mode<synchronous>, transform_indices = @transform_1, window_bounds = array<i64: 128, 128>}, {transform_indices = @transform_2, window_bounds = array<i64: 17, 128>}, {transform_indices = @transform_3, window_bounds = array<i64: 1, 17, 128>}]} {
    %c0 = arith.constant 0 : index
    %c0_0 = arith.constant 0 : index
    %c0_1 = arith.constant 0 : index
    %0 = vector.load %arg2[%c0, %c0_0, %c0_1] : memref<1x17x128xbf16, #tpu.memory_space<vmem>>, vector<1x17x128xbf16>
    %1 = vector.shape_cast %0 : vector<1x17x128xbf16> to vector<17x128xbf16>
    %c0_2 = arith.constant 0 : index
    %c0_3 = arith.constant 0 : index
    %2 = vector.load %arg3[%c0_2, %c0_3] : memref<128x128xbf16, #tpu.memory_space<vmem>>, vector<128x128xbf16>
    %cst = arith.constant dense<0.000000e+00> : vector<17x128xf32>
    %3 = tpu.matmul %1, %2, %cst {dimension_numbers = #tpu.dot_dimension_numbers<[1], [0], [0], [1], [0, 0, 1, 1], [], []>} : vector<17x128xbf16>, vector<128x128xbf16>, vector<17x128xf32> -> vector<17x128xf32>
    %c0_4 = arith.constant 0 : index
    %c0_5 = arith.constant 0 : index
    %4 = vector.load %arg4[%c0_4, %c0_5] : memref<17x128xf32, #tpu.memory_space<vmem>>, vector<17x128xf32>
    %5 = arith.addf %3, %4 : vector<17x128xf32>
    %c0_6 = arith.constant 0 : index
    %c0_7 = arith.constant 0 : index
    %c0_8 = arith.constant 0 : index
    %6 = vector.load %arg5[%c0_6, %c0_7, %c0_8] : memref<1x17x128xf32, #tpu.memory_space<vmem>>, vector<1x17x128xf32>
    %7 = vector.shape_cast %6 : vector<1x17x128xf32> to vector<17x128xf32>
    %8 = vector.shape_cast %5 : vector<17x128xf32> to vector<1x17x128xf32>
    tpu.vector_store %arg5[%c0_6, %c0_7, %c0_8], %8 {strides = array<i32>} : memref<1x17x128xf32, #tpu.memory_space<vmem>>, vector<1x17x128xf32>,
    return
  }
  func.func @transform_0(%arg0: i32, %arg1: i32) -> (i32, i32, i32) {
    %c0_i32 = arith.constant 0 : i32
    %c0_i32_0 = arith.constant 0 : i32
    return %arg1, %arg0, %c0_i32 : i32, i32, i32
  }
  func.func @transform_1(%arg0: i32, %arg1: i32) -> (i32, i32) {
    %c0_i32 = arith.constant 0 : i32
    %c0_i32_0 = arith.constant 0 : i32
    %c0_i32_1 = arith.constant 0 : i32
    return %c0_i32, %c0_i32_0 : i32, i32
  }
  func.func @transform_2(%arg0: i32, %arg1: i32) -> (i32, i32) {
    %c0_i32 = arith.constant 0 : i32
    %c0_i32_0 = arith.constant 0 : i32
    return %arg0, %c0_i32 : i32, i32
  }
  func.func @transform_3(%arg0: i32, %arg1: i32) -> (i32, i32, i32) {
    %c0_i32 = arith.constant 0 : i32
    %c0_i32_0 = arith.constant 0 : i32
    return %arg1, %arg0, %c0_i32 : i32, i32, i32
  }
}

</mosaic_0001>

<bundles_post_ra>
// kernel: patch_embedding.1
= control target key start
LH: loop header
LB: loop body
LE: loop exit
PB: predicated region body
PF: predicated region fallthrough
CT: control target
= control target key end

     0   :  { %s596_s12 = smov 0   ;;  %s598_s13 = smov 0   ;;  %s666_s0 = inlined_call_operand.vmem [shape: bf16[2,17,128], index: 0, kind: input, shape index: {}]   ;;  %s667_s1 = inlined_call_operand.vmem [shape: bf16[128,128], index: 1, kind: input, shape index: {}]   ;;  %s668_s2 = inlined_call_operand.vmem [shape: f32[17,128], index: 2, kind: input, shape index: {}]   ;;  %s669_s3 = inlined_call_operand.vmem [shape: f32[2,17,128], index: 3, kind: output, shape index: {}]  }
   0x1   :  { %s600_s14 = smov 0  }
   0x2 LB: > { %s22_s15 = sadd.s32 1, %s570_s13  ;;  %p471_p0 = scmp.ge.s32.totalorder %s574_s14, 1  ;;  %s574_s14 = sphi %s600_s14, %s13_s14   ;;  %s570_s13 = sphi %s598_s13, %s671_s13   ;;  %s566_s12 = sphi %s596_s12, %s670_s12  }
   0x3   : > { %p23_p1 = scmp.ge.s32.totalorder %s22_s15, 2  ;;  %p169_p2 = scmp.lt.s32.totalorder %s574_s14, 3 }
   0x5   : > { %s673_s15 = smov (%p23_p1, %s22_s15), 0  ;;  %p170_p3 = pnand %p471_p0, %p169_p2 }
   0x6   : > { %v542_v0 = vld [vmem:[%s667_s1] sm:$0xff] (!%p170_p3)   ;;  %p207_p4 = scmp.lt.s32.totalorder (!%p170_p3), %s566_s12, 1  ;;  %v543_v1 = vld [vmem:[%s667_s1 + $0x8] sm:$0xff] (!%p170_p3)   ;;  %v544_v2 = vld [vmem:[%s667_s1 + $0x10] sm:$0xff] (!%p170_p3)  }
   0x7   : > { %173 = sbr.rel (%p170_p3) target bundleno = 257 (0x101), region = 32  ;;  %496 = vmatprep.subr.bf16.mxu0 (!%p170_p3), %v542_v0  ;;  %v545_v3 = vld [vmem:[%s667_s1 + $0x18] sm:$0xff] (!%p170_p3)   ;;  %v546_v5 = vld [vmem:[%s667_s1 + $0x20] sm:$0xff] (!%p170_p3)   ;;  %v547_v6 = vld [vmem:[%s667_s1 + $0x28] sm:$0xff] (!%p170_p3)  }
   0x8   : > { %497 = vmatpush3.bf16.msra.mxu0 (!%p170_p3), %v542_v0  ;;  %v548_v7 = vld [vmem:[%s667_s1 + $0x30] sm:$0xff] (!%p170_p3)   ;;  %v549_v8 = vld [vmem:[%s667_s1 + $0x38] sm:$0xff] (!%p170_p3)   ;;  %v252_v11 = vld [vmem:[%s668_s2] sm:$0xff] (!%p170_p3) }
   0x9   : > { %498 = vmatprep.subr.bf16.mxu0 (!%p170_p3), %v543_v1  ;;  %v254_v10 = vld [vmem:[%s668_s2 + $0x10] sm:$0x1] (!%p170_p3)  ;;  %v253_v15 = vld [vmem:[%s668_s2 + $0x8] sm:$0xff] (!%p170_p3) }
   0xc   : > { %499 = vmatpush3.bf16.msra.mxu0 (!%p170_p3), %v543_v1 }
   0xd   : > { %500 = vmatprep.subr.bf16.mxu0 (!%p170_p3), %v544_v2 }
   0xe   : > { %s675_s12 = smov (!%p207_p4, %s566_s12), 1 }
   0xf   : > { %s516_s22 = smul.u32 12, %s675_s12 }
  0x10   : > { %501 = vmatpush3.bf16.msra.mxu0 %v544_v2  ;;  %s517_s9 = smul.u32 24, %s675_s12 }
  0x11   : > { %s214_s25 = scalar_lea.vmem %s666_s0, %s516_s22  ;;  %502 = vmatprep.subr.bf16.mxu0 %v545_v3 }
  0x12   : > { %v550_v4 = vld [vmem:[%s214_s25] sm:$0xff]   ;;  %v551_v9 = vld [vmem:[%s214_s25 + $0x8] ss:$0 sps:$4 sm:$0x11]   ;;  %s230_s20 = scalar_lea.vmem %s669_s3, %s517_s9 }
  0x13   : > { %512 = vmatprep.mubr.bf16.mxu0 %v550_v4 }
  0x14   : > { %503 = vmatpush3.bf16.msra.mxu0 %v545_v3 }
  0x15   : > { %504 = vmatprep.subr.bf16.mxu0 %v546_v5 }
  0x18   : > { %505 = vmatpush3.bf16.msra.mxu0 %v546_v5 }
  0x19   : > { %506 = vmatprep.subr.bf16.mxu0 %v547_v6 }
  0x1c   : > { %507 = vmatpush3.bf16.msra.mxu0 %v547_v6 }
  0x1d   : > { %508 = vmatprep.subr.bf16.mxu0 %v548_v7 }
  0x20   : > { %509 = vmatpush3.bf16.msra.mxu0 %v548_v7 }
  0x21   : > { %510 = vmatprep.subr.bf16.mxu0 %v549_v8 }
  0x24   : > { %511 = vmatpush3.bf16.msra.mxu0 %v549_v8 }
  0x27   : > { %513 = vmatmul.mubr.bf16.vlgmr.msra.gmra.mrb[0].mxu0 %v551_v9 }
  0xfa   : > { %v514_v12 = vpop.f32.mrb[0].mxu0 }
  0xfb   : > { %v356_v13 = vadd.f32 %v514_v12, %v254_v10  ;;  %v347_v14 = vpop.f32.mrb[1].mxu0 }
  0xfc   : > { %v348_v16 = vadd.f32 %v347_v14, %v252_v11  ;;  %v515_v17 = vpop.f32.mrb[2].mxu0 }
  0xfd   : > { %363 = vst [vmem:[%s230_s20 + $0x10] sm:$0x1] %v356_v13  ;;  %v350_v18 = vpop.f32.mrb[3].mxu0 }
  0xfe   : > { %361 = vst [vmem:[%s230_s20] sm:$0xff] %v348_v16  ;;  %v351_v19 = vadd.f32 %v350_v18, %v253_v15 }
 0x100   : > { %362 = vst [vmem:[%s230_s20 + $0x8] sm:$0xff] %v351_v19 }
 0x101 PF: > { %s13_s14 = sadd.s32 1, %s574_s14   ;;  %s670_s12 = smov %s570_s13 }
 0x102   : > { %p10_p5 = scmp.ge.s32.totalorder %s13_s14, 4   ;;  %s671_s13 = smov %s673_s15 }
 0x104   :  { %12 = sbr.rel (!%p10_p5) target bundleno = 2 (0x2), region = 65 }

</bundles_post_ra>
